<compile_context>
chip_gen: v5e
topology: v5e:2x2
jax: 0.10.0
libtpu: 0.0.40
codegen_flags: <defaults>
</compile_context>

<pallas_src>
import math

import jax
import jax.numpy as jnp
from jax.experimental import pallas as pl
from jax.experimental.pallas import tpu as pltpu


_SQRT_HALF = 0.7071067811865476


def _round_up(a, m):
    return (a + m - 1) // m * m


def _erf_approx(x):
    # Abramowitz & Stegun 7.1.26, |err| <= 1.5e-7.  Only exp/mul/add/where, so
    # it lowers cleanly in Mosaic and matches torch's exact (erf) GELU closely.
    a1, a2, a3, a4, a5 = (0.254829592, -0.284496736, 1.421413741,
                          -1.453152027, 1.061405429)
    p = 0.3275911
    ax = jnp.abs(x)
    t = 1.0 / (1.0 + p * ax)
    poly = t * (a1 + t * (a2 + t * (a3 + t * (a4 + t * a5))))
    y = 1.0 - poly * jnp.exp(-ax * ax)
    return jnp.where(x >= 0, y, -y)


def _gelu_exact(x):
    # torch.nn.functional.gelu default (erf form)
    return 0.5 * x * (1.0 + _erf_approx(x * _SQRT_HALF))


def _make_ffn_kernel(tp, hw, need_mask):
    def kernel(x_ref, w1_ref, b1_ref, w2_ref, b2_ref, y_ref, sum_ref):
        t = pl.program_id(1)

        x = x_ref[0].astype(jnp.float32)          # (C, tp)   lane = spatial
        w1 = w1_ref[...].astype(jnp.float32)      # (hid2, C)
        b1 = b1_ref[...].astype(jnp.float32)      # (hid2, 1)
        w2 = w2_ref[...].astype(jnp.float32)      # (C, hid2)
        b2 = b2_ref[...].astype(jnp.float32)      # (C, 1)

        # conv1 (1x1) + bias -> GELU -> conv2 (1x1) + bias, fused on this tile.
        h = jnp.dot(w1, x, preferred_element_type=jnp.float32,
                    precision=jax.lax.Precision.HIGHEST) + b1      # (hid2, tp)
        h = _gelu_exact(h)
        y = jnp.dot(w2, h, preferred_element_type=jnp.float32,
                    precision=jax.lax.Precision.HIGHEST) + b2      # (C, tp)

        y_ref[0] = y.astype(y_ref.dtype)

        # Fused ECA global-average-pool numerator: per-(batch, channel) spatial
        # sum, accumulated over the spatial grid axis (t, "arbitrary").
        @pl.when(t == 0)
        def _():
            sum_ref[...] = jnp.zeros_like(sum_ref)

        if need_mask:
            lane = jax.lax.broadcasted_iota(jnp.int32, y.shape, 1) + t * tp
            y_sum_src = jnp.where(lane < hw, y, 0.0)
        else:
            y_sum_src = y
        sum_ref[0] = sum_ref[0] + jnp.sum(y_sum_src, axis=1, keepdims=True)

    return kernel


def _scale_kernel(y_ref, s_ref, o_ref):
    # Channel-attention apply: out[b, c, p] = y[b, c, p] * scale[b, c]
    o_ref[...] = (y_ref[...].astype(jnp.float32) *
                  s_ref[...].astype(jnp.float32)).astype(o_ref.dtype)


def _eca_conv1d(mean_bc, w):
    # ECA_layer's Conv1d(1, 1, k, bias=False) over the channel axis of the
    # pooled (B, C) vector (cross-correlation, zero padding (k-1)//2).
    # TODO(synk): stays in plain JAX -- k<=5 taps over B*C scalars is
    # negligible work, not worth a dedicated Pallas kernel.
    k = w.shape[0]
    pad = (k - 1) // 2
    c = mean_bc.shape[1]
    mp = jnp.pad(mean_bc, ((0, 0), (pad, pad)))
    out = jnp.zeros_like(mean_bc)
    for j in range(k):
        out = out + w[j] * mp[:, j:j + c]
    return out


def gasa_feed_forward(x, w1, b1, w2, b2, eca_weight=None, *,
                      spatial_tile=None, vmem_budget_bytes=8 * 1024 * 1024):
    """FeedForward.forward from models/GASA.py.

    x:          (B, C, H, W) NCHW, as the PyTorch module expects.
    w1, b1:     conv1.weight.reshape(hid2, C), conv1.bias   (hid2 = 2*hidden)
    w2, b2:     conv2.weight.reshape(C, hid2), conv2.bias
    eca_weight: ECA Conv1d weight of shape (k,), or None if use_CA=False.
    """
    B, C, H, W = x.shape
    hid2 = w1.shape[0]
    assert w1.shape == (hid2, C) and w2.shape == (C, hid2)
    assert b1.shape == (hid2,) and b2.shape == (C,)
    hw = H * W

    # Spatial (lane) tile: multiple of 128, sized against a VMEM budget
    # (double-buffered x/y blocks + hidden activation), never shrunk to tiny
    # or misaligned tiles; ragged H*W handled via pad + in-kernel mask.
    per_pos_bytes = 4 * (2 * C + 2 * C + 3 * hid2)
    tp = spatial_tile
    if tp is None:
        tp = max(128, (vmem_budget_bytes // per_pos_bytes) // 128 * 128)
    tp = min(tp, _round_up(hw, 128))
    hw_pad = _round_up(hw, tp)
    nt = hw_pad // tp

    x3 = x.reshape(B, C, hw)
    if hw_pad != hw:
        x3 = jnp.pad(x3, ((0, 0), (0, 0), (0, hw_pad - hw)))

    w1f = w1.astype(jnp.float32)
    w2f = w2.astype(jnp.float32)
    b1c = b1.astype(jnp.float32).reshape(hid2, 1)
    b2c = b2.astype(jnp.float32).reshape(C, 1)

    kernel = _make_ffn_kernel(tp, hw, need_mask=(hw_pad != hw))

    y_pad, sums = pl.pallas_call(
        kernel,
        out_shape=(
            jax.ShapeDtypeStruct((B, C, hw_pad), x.dtype),
            jax.ShapeDtypeStruct((B, C, 1), jnp.float32),
        ),
        grid_spec=pltpu.PrefetchScalarGridSpec(
            num_scalar_prefetch=0,
            grid=(B, nt),
            in_specs=[
                pl.BlockSpec((1, C, tp), lambda b, t: (b, 0, t)),
                pl.BlockSpec((hid2, C), lambda b, t: (0, 0)),
                pl.BlockSpec((hid2, 1), lambda b, t: (0, 0)),
                pl.BlockSpec((C, hid2), lambda b, t: (0, 0)),
                pl.BlockSpec((C, 1), lambda b, t: (0, 0)),
            ],
            out_specs=[
                pl.BlockSpec((1, C, tp), lambda b, t: (b, 0, t)),
                pl.BlockSpec((1, C, 1), lambda b, t: (b, 0, 0)),
            ],
        ),
        compiler_params=pltpu.CompilerParams(
            dimension_semantics=("parallel", "arbitrary"),
            vmem_limit_bytes=32 * 1024 * 1024,
        ),
    )(x3, w1f, b1c, w2f, b2c)

    if eca_weight is not None:
        mean_bc = sums[:, :, 0] / float(hw)                         # (B, C)
        scale = _eca_conv1d(mean_bc, eca_weight.astype(jnp.float32))
        scale3 = scale[:, :, None]                                  # (B, C, 1)
        y_pad = pl.pallas_call(
            _scale_kernel,
            out_shape=jax.ShapeDtypeStruct((B, C, hw_pad), x.dtype),
            grid_spec=pltpu.PrefetchScalarGridSpec(
                num_scalar_prefetch=0,
                grid=(B, nt),
                in_specs=[
                    pl.BlockSpec((1, C, tp), lambda b, t: (b, 0, t)),
                    pl.BlockSpec((1, C, 1), lambda b, t: (b, 0, 0)),
                ],
                out_specs=pl.BlockSpec((1, C, tp), lambda b, t: (b, 0, t)),
            ),
            compiler_params=pltpu.CompilerParams(
                dimension_semantics=("parallel", "parallel"),
                vmem_limit_bytes=32 * 1024 * 1024,
            ),
        )(y_pad, scale3)

    y = y_pad
    if hw_pad != hw:
        y = y[:, :, :hw]
    return y.reshape(B, C, H, W)


# ----------------------------- reference & test -----------------------------

def _eca_k_size(channel):
    b, gamma = 1, 2
    k = int(abs(math.log(channel, 2) + b) / gamma)
    return k if k % 2 else k + 1


def _reference(x, w1, b1, w2, b2, eca_w):
    hp = jax.lax.Precision.HIGHEST
    xf = x.astype(jnp.float32)
    h = jnp.einsum('oc,bchw->bohw', w1, xf, precision=hp) + b1[None, :, None, None]
    h = jax.nn.gelu(h, approximate=False)          # exact erf GELU (PyTorch default)
    y = jnp.einsum('co,bohw->bchw', w2, h, precision=hp) + b2[None, :, None, None]
    if eca_w is not None:
        m = jnp.mean(y, axis=(2, 3))               # global average pool (B, C)
        s = _eca_conv1d(m, eca_w)
        y = y * s[:, :, None, None]                # note: module has no sigmoid
    return y.astype(x.dtype)


def _run_case(B, dim, ffn_expansion_factor, H, W, use_CA):
    hidden = int(dim * ffn_expansion_factor)
    hid2 = 2 * hidden
    key = jax.random.PRNGKey(0)
    k1, k2, k3, k4, k5, k6 = jax.random.split(key, 6)
    x = jax.random.normal(k1, (B, dim, H, W), jnp.float32)
    w1 = jax.random.normal(k2, (hid2, dim), jnp.float32) / math.sqrt(dim)
    b1 = 0.1 * jax.random.normal(k3, (hid2,), jnp.float32)
    w2 = jax.random.normal(k4, (dim, hid2), jnp.float32) / math.sqrt(hid2)
    b2 = 0.1 * jax.random.normal(k5, (dim,), jnp.float32)
    eca_w = None
    if use_CA:
        eca_w = jax.random.normal(k6, (_eca_k_size(dim),), jnp.float32)

    y = gasa_feed_forward(x, w1, b1, w2, b2, eca_w)
    y = jax.block_until_ready(y)

    ref = _reference(x, w1, b1, w2, b2, eca_w)
    assert y.shape == x.shape
    assert jnp.allclose(y, ref, atol=1e-3, rtol=1e-3), \
        float(jnp.max(jnp.abs(y - ref)))


if __name__ == "__main__":
    # use_CA=True, dim=8 -> ECA k_size=3; H*W=256 fits the 128-lane tile exactly
    _run_case(B=2, dim=8, ffn_expansion_factor=2.0, H=16, W=16, use_CA=True)
    # ragged spatial size (H*W=63 -> padded + masked tile), ECA k_size=1
    _run_case(B=2, dim=4, ffn_expansion_factor=1.0, H=7, W=9, use_CA=True)
    # use_CA=False path (plain conv1 -> gelu -> conv2)
    _run_case(B=1, dim=4, ffn_expansion_factor=2.66, H=10, W=10, use_CA=False)
    print("KERNEL_OK")
</pallas_src>

<mosaic_0001>
module attributes {stable_mosaic.version = 11 : i64} {
  func.func @kernel(%arg0: i32, %arg1: i32, %arg2: memref<1x8x256xf32, #tpu.memory_space<vmem>>, %arg3: memref<32x8xf32, #tpu.memory_space<vmem>>, %arg4: memref<32x1xf32, #tpu.memory_space<vmem>>, %arg5: memref<8x32xf32, #tpu.memory_space<vmem>>, %arg6: memref<8x1xf32, #tpu.memory_space<vmem>>, %arg7: memref<1x8x256xf32, #tpu.memory_space<vmem>>, %arg8: memref<1x8x1xf32, #tpu.memory_space<vmem>>) attributes {dimension_semantics = [#tpu.dimension_semantics<parallel>, #tpu.dimension_semantics<arbitrary>], iteration_bounds = array<i64: 2, 1>, scalar_prefetch = 0 : i64, scratch_operands = 0 : i64, tpu.core_type = #tpu.core_type<tc>, window_params = [{transform_indices = @transform_0, window_bounds = array<i64: 1, 8, 256>}, {pipeline_mode = #tpu.pipeline_mode<synchronous>, transform_indices = @transform_1, window_bounds = array<i64: 32, 8>}, {pipeline_mode = #tpu.pipeline_mode<synchronous>, transform_indices = @transform_2, window_bounds = array<i64: 32, 1>}, {pipeline_mode = #tpu.pipeline_mode<synchronous>, transform_indices = @transform_3, window_bounds = array<i64: 8, 32>}, {pipeline_mode = #tpu.pipeline_mode<synchronous>, transform_indices = @transform_4, window_bounds = array<i64: 8, 1>}, {transform_indices = @transform_5, window_bounds = array<i64: 1, 8, 256>}, {transform_indices = @transform_6, window_bounds = array<i64: 1, 8, 1>}]} {
    %c0 = arith.constant 0 : index
    %c0_0 = arith.constant 0 : index
    %c0_1 = arith.constant 0 : index
    %0 = vector.load %arg2[%c0, %c0_0, %c0_1] : memref<1x8x256xf32, #tpu.memory_space<vmem>>, vector<1x8x256xf32>
    %1 = vector.shape_cast %0 : vector<1x8x256xf32> to vector<8x256xf32>
    %c0_2 = arith.constant 0 : index
    %c0_3 = arith.constant 0 : index
    %2 = vector.load %arg3[%c0_2, %c0_3] : memref<32x8xf32, #tpu.memory_space<vmem>>, vector<32x8xf32>
    %c0_4 = arith.constant 0 : index
    %c0_5 = arith.constant 0 : index
    %3 = vector.load %arg4[%c0_4, %c0_5] : memref<32x1xf32, #tpu.memory_space<vmem>>, vector<32x1xf32>
    %c0_6 = arith.constant 0 : index
    %c0_7 = arith.constant 0 : index
    %4 = vector.load %arg5[%c0_6, %c0_7] : memref<8x32xf32, #tpu.memory_space<vmem>>, vector<8x32xf32>
    %c0_8 = arith.constant 0 : index
    %c0_9 = arith.constant 0 : index
    %5 = vector.load %arg6[%c0_8, %c0_9] : memref<8x1xf32, #tpu.memory_space<vmem>>, vector<8x1xf32>
    %cst = arith.constant dense<0.000000e+00> : vector<32x256xf32>
    %6 = tpu.matmul %2, %1, %cst {dimension_numbers = #tpu.dot_dimension_numbers<[1], [0], [0], [1], [0, 0, 1, 1], [], []>, precision = #tpu.contract_precision<fp32>} : vector<32x8xf32>, vector<8x256xf32>, vector<32x256xf32> -> vector<32x256xf32>
    %7 = vector.broadcast %3 : vector<32x1xf32> to vector<32x256xf32>
    %8 = arith.addf %6, %7 : vector<32x256xf32>
    %cst_10 = arith.constant 5.000000e-01 : f32
    %9 = vector.broadcast %cst_10 : f32 to vector<32x256xf32>
    %10 = arith.mulf %9, %8 : vector<32x256xf32>
    %cst_11 = arith.constant 0.707106769 : f32
    %11 = vector.broadcast %cst_11 : f32 to vector<32x256xf32>
    %12 = arith.mulf %8, %11 : vector<32x256xf32>
    %13 = math.absf %12 : vector<32x256xf32>
    %cst_12 = arith.constant 0.327591091 : f32
    %14 = vector.broadcast %cst_12 : f32 to vector<32x256xf32>
    %15 = arith.mulf %14, %13 : vector<32x256xf32>
    %cst_13 = arith.constant 1.000000e+00 : f32
    %16 = vector.broadcast %cst_13 : f32 to vector<32x256xf32>
    %17 = arith.addf %16, %15 : vector<32x256xf32>
    %cst_14 = arith.constant 1.000000e+00 : f32
    %18 = vector.broadcast %cst_14 : f32 to vector<32x256xf32>
    %19 = arith.divf %18, %17 : vector<32x256xf32>
    %cst_15 = arith.constant 1.06140542 : f32
    %20 = vector.broadcast %cst_15 : f32 to vector<32x256xf32>
    %21 = arith.mulf %19, %20 : vector<32x256xf32>
    %cst_16 = arith.constant -1.45315206 : f32
    %22 = vector.broadcast %cst_16 : f32 to vector<32x256xf32>
    %23 = arith.addf %22, %21 : vector<32x256xf32>
    %24 = arith.mulf %19, %23 : vector<32x256xf32>
    %cst_17 = arith.constant 1.42141378 : f32
    %25 = vector.broadcast %cst_17 : f32 to vector<32x256xf32>
    %26 = arith.addf %25, %24 : vector<32x256xf32>
    %27 = arith.mulf %19, %26 : vector<32x256xf32>
    %cst_18 = arith.constant -0.284496725 : f32
    %28 = vector.broadcast %cst_18 : f32 to vector<32x256xf32>
    %29 = arith.addf %28, %27 : vector<32x256xf32>
    %30 = arith.mulf %19, %29 : vector<32x256xf32>
    %cst_19 = arith.constant 0.254829586 : f32
    %31 = vector.broadcast %cst_19 : f32 to vector<32x256xf32>
    %32 = arith.addf %31, %30 : vector<32x256xf32>
    %33 = arith.mulf %19, %32 : vector<32x256xf32>
    %cst_20 = arith.constant 0.000000e+00 : f32
    %34 = vector.broadcast %cst_20 : f32 to vector<32x256xf32>
    %35 = arith.subf %34, %13 : vector<32x256xf32>
    %36 = arith.mulf %35, %13 : vector<32x256xf32>
    %37 = math.exp %36 : vector<32x256xf32>
    %38 = arith.mulf %33, %37 : vector<32x256xf32>
    %cst_21 = arith.constant 1.000000e+00 : f32
    %39 = vector.broadcast %cst_21 : f32 to vector<32x256xf32>
    %40 = arith.subf %39, %38 : vector<32x256xf32>
    %cst_22 = arith.constant 0.000000e+00 : f32
    %41 = vector.broadcast %cst_22 : f32 to vector<32x256xf32>
    %42 = arith.cmpf oge, %12, %41 : vector<32x256xf32>
    %cst_23 = arith.constant 0.000000e+00 : f32
    %43 = vector.broadcast %cst_23 : f32 to vector<32x256xf32>
    %44 = arith.subf %43, %40 : vector<32x256xf32>
    %45 = arith.select %42, %40, %44 : vector<32x256xi1>, vector<32x256xf32>
    %cst_24 = arith.constant 1.000000e+00 : f32
    %46 = vector.broadcast %cst_24 : f32 to vector<32x256xf32>
    %47 = arith.addf %46, %45 : vector<32x256xf32>
    %48 = arith.mulf %10, %47 : vector<32x256xf32>
    %cst_25 = arith.constant dense<0.000000e+00> : vector<8x256xf32>
    %49 = tpu.matmul %4, %48, %cst_25 {dimension_numbers = #tpu.dot_dimension_numbers<[1], [0], [0], [1], [0, 0, 1, 1], [], []>, precision = #tpu.contract_precision<fp32>} : vector<8x32xf32>, vector<32x256xf32>, vector<8x256xf32> -> vector<8x256xf32>
    %50 = vector.broadcast %5 : vector<8x1xf32> to vector<8x256xf32>
    %51 = arith.addf %49, %50 : vector<8x256xf32>
    %c0_26 = arith.constant 0 : index
    %c0_27 = arith.constant 0 : index
    %c0_28 = arith.constant 0 : index
    %52 = vector.load %arg7[%c0_26, %c0_27, %c0_28] : memref<1x8x256xf32, #tpu.memory_space<vmem>>, vector<1x8x256xf32>
    %53 = vector.shape_cast %52 : vector<1x8x256xf32> to vector<8x256xf32>
    %54 = vector.shape_cast %51 : vector<8x256xf32> to vector<1x8x256xf32>
    tpu.vector_store %arg7[%c0_26, %c0_27, %c0_28], %54 {strides = array<i32>} : memref<1x8x256xf32, #tpu.memory_space<vmem>>, vector<1x8x256xf32>,
    %c0_i32 = arith.constant 0 : i32
    %55 = arith.cmpi eq, %arg1, %c0_i32 : i32
    %56 = arith.extui %55 : i1 to i32
    %c0_i32_29 = arith.constant 0 : i32
    %57 = arith.cmpi ne, %56, %c0_i32_29 : i32
    scf.if %57 {
      %cst_37 = arith.constant 0.000000e+00 : f32
      %66 = vector.broadcast %cst_37 : f32 to vector<1x8x1xf32>
      %c0_38 = arith.constant 0 : index
      %c0_39 = arith.constant 0 : index
      %c0_40 = arith.constant 0 : index
      %67 = vector.load %arg8[%c0_38, %c0_39, %c0_40] : memref<1x8x1xf32, #tpu.memory_space<vmem>>, vector<1x8x1xf32>
      tpu.vector_store %arg8[%c0_38, %c0_39, %c0_40], %66 {strides = array<i32>} : memref<1x8x1xf32, #tpu.memory_space<vmem>>, vector<1x8x1xf32>,
    } else {
    }
    %c0_30 = arith.constant 0 : index
    %c0_31 = arith.constant 0 : index
    %c0_32 = arith.constant 0 : index
    %58 = vector.load %arg8[%c0_30, %c0_31, %c0_32] : memref<1x8x1xf32, #tpu.memory_space<vmem>>, vector<1x8x1xf32>
    %59 = vector.shape_cast %58 : vector<1x8x1xf32> to vector<8x1xf32>
    %cst_33 = arith.constant dense<0.000000e+00> : vector<8xf32>
    %60 = vector.multi_reduction <add>, %51, %cst_33 [1] : vector<8x256xf32> to vector<8xf32>
    %61 = vector.shape_cast %60 : vector<8xf32> to vector<8x1xf32>
    %62 = arith.addf %59, %61 : vector<8x1xf32>
    %c0_34 = arith.constant 0 : index
    %c0_35 = arith.constant 0 : index
    %c0_36 = arith.constant 0 : index
    %63 = vector.load %arg8[%c0_34, %c0_35, %c0_36] : memref<1x8x1xf32, #tpu.memory_space<vmem>>, vector<1x8x1xf32>
    %64 = vector.shape_cast %63 : vector<1x8x1xf32> to vector<8x1xf32>
    %65 = vector.shape_cast %62 : vector<8x1xf32> to vector<1x8x1xf32>
    tpu.vector_store %arg8[%c0_34, %c0_35, %c0_36], %65 {strides = array<i32>} : memref<1x8x1xf32, #tpu.memory_space<vmem>>, vector<1x8x1xf32>,
    return
  }
  func.func @transform_0(%arg0: i32, %arg1: i32) -> (i32, i32, i32) {
    %c0_i32 = arith.constant 0 : i32
    %c0_i32_0 = arith.constant 0 : i32
    return %arg0, %c0_i32, %arg1 : i32, i32, i32
  }
  func.func @transform_1(%arg0: i32, %arg1: i32) -> (i32, i32) {
    %c0_i32 = arith.constant 0 : i32
    %c0_i32_0 = arith.constant 0 : i32
    %c0_i32_1 = arith.constant 0 : i32
    return %c0_i32, %c0_i32_0 : i32, i32
  }
  func.func @transform_2(%arg0: i32, %arg1: i32) -> (i32, i32) {
    %c0_i32 = arith.constant 0 : i32
    %c0_i32_0 = arith.constant 0 : i32
    %c0_i32_1 = arith.constant 0 : i32
    return %c0_i32, %c0_i32_0 : i32, i32
  }
  func.func @transform_3(%arg0: i32, %arg1: i32) -> (i32, i32) {
    %c0_i32 = arith.constant 0 : i32
    %c0_i32_0 = arith.constant 0 : i32
    %c0_i32_1 = arith.constant 0 : i32
    return %c0_i32, %c0_i32_0 : i32, i32
  }
  func.func @transform_4(%arg0: i32, %arg1: i32) -> (i32, i32) {
    %c0_i32 = arith.constant 0 : i32
    %c0_i32_0 = arith.constant 0 : i32
    %c0_i32_1 = arith.constant 0 : i32
    return %c0_i32, %c0_i32_0 : i32, i32
  }
  func.func @transform_5(%arg0: i32, %arg1: i32) -> (i32, i32, i32) {
    %c0_i32 = arith.constant 0 : i32
    %c0_i32_0 = arith.constant 0 : i32
    return %arg0, %c0_i32, %arg1 : i32, i32, i32
  }
  func.func @transform_6(%arg0: i32, %arg1: i32) -> (i32, i32, i32) {
    %c0_i32 = arith.constant 0 : i32
    %c0_i32_0 = arith.constant 0 : i32
    %c0_i32_1 = arith.constant 0 : i32
    return %arg0, %c0_i32, %c0_i32_0 : i32, i32, i32
  }
}

</mosaic_0001>

<bundles_post_ra>
// kernel: tpu_custom_call.1
= control target key start
LH: loop header
LB: loop body
LE: loop exit
PB: predicated region body
PF: predicated region fallthrough
CT: control target
= control target key end

     0   :  { %12 = vsyncpa [#allocation3], 0  ;;  %s2386_s0 = inlined_call_operand.vmem [shape: f32[2,8,256], index: 0, kind: input, shape index: {}]   ;;  %s2387_s1 = inlined_call_operand.vmem [shape: f32[32,8], index: 1, kind: input, shape index: {}]   ;;  %s2388_s2 = inlined_call_operand.vmem [shape: f32[32,1], index: 2, kind: input, shape index: {}]   ;;  %s2389_s3 = inlined_call_operand.vmem [shape: f32[8,32], index: 3, kind: input, shape index: {}]   ;;  %s2390_s4 = inlined_call_operand.vmem [shape: f32[8,1], index: 4, kind: input, shape index: {}]   ;;  %s2391_s5 = inlined_call_operand.hbm [shape: f32[2,8,256], index: 5, kind: output, shape index: {0}]   ;;  %s2392_s6 = inlined_call_operand.vmem [shape: f32[2,8,1], index: 6, kind: output, shape index: {1}]  }
   0x1   :  { %14 = vsyncpa [#allocation3 + $0x1], 0  ;;  %s1880_s21 = smov 0   ;;  %s1882_s22 = smov 0  }
   0x2   :  { %s1884_s23 = smov 0   ;;  %s1886_s24 = smov 0  }
   0x3   :  { %s1888_s25 = smov 0   ;;  %s1890_s26 = smov 0  }
   0x4 LB: > { %s1655_s27 = sadd.s32 4294967295, %s1841_s26   ;;  %s1656_s28 = sadd.s32 4294967294, %s1841_s26   ;;  %s1841_s26 = sphi %s1890_s26, %s20_s26   ;;  %s1837_s25 = sphi %s1888_s25, %s2401_s25   ;;  %s1833_s24 = sphi %s1886_s24, %s2400_s24   ;;  %s1829_s23 = sphi %s1884_s23, %s2399_s23   ;;  %s1825_s22 = sphi %s1882_s22, %s2398_s22   ;;  %s1821_s21 = sphi %s1880_s21, %s2397_s21  }
   0x5   : > { %s32_s29 = sadd.s32 1, %s1837_s25  ;;  %s153_s30 = sadd.s32 1, %s1829_s23 }
   0x6   : > { %p34_p0 = scmp.ge.s32.totalorder %s32_s29, 2  ;;  %p163_p1 = scmp.ne.s32.totalorder %s1829_s23, %s1825_s22 }
   0x7   : > { %p164_p2 = scmp.eq.s32.totalorder %s1655_s27, 1  ;;  %p169_p3 = scmp.ne.s32.totalorder %s1825_s22, %s1821_s21 }
   0x8   : > { %s2403_s29 = smov (%p34_p0, %s32_s29), 0  ;;  %p170_p5 = scmp.eq.s32.totalorder %s1656_s28, 1 }
   0x9   : > { %p1920_p4 = por %p164_p2, %p163_p1  ;;  %s148_s8 = ssub.s32 %s1837_s25, %s2403_s29 }
   0xa   : > { %p1659_p6 = scmp.ge.s32.totalorder %s1841_s26, 1  ;;  %p151_p7 = scmp.eq.s32.totalorder %s148_s8, 0 }
   0xb   : > { %p1927_p8 = por %p170_p5, %p169_p3  ;;  %p239_p9 = scmp.lt.s32.totalorder %s1841_s26, 3 }
   0xc   : > { %s1933_s10 = scalar_select %p151_p7, %s1829_s23, %s153_s30  }
   0xd   : > { %p240_p10 = pnand %p1659_p6, %p239_p9 }
   0xe   : > { %p278_p11 = scmp.lt.s32.totalorder (!%p240_p10), %s1833_s24, 1  ;;  %s268_s30 = sand.u32 (!%p240_p10), 1, %s1825_s22  }
   0xf   : > { %243 = sbr.rel (%p240_p10) target bundleno = 594 (0x252), region = 40  ;;  %s1660_s8 = sshll.u32 (!%p240_p10), %s268_s30, 4 }
  0x10   : > { %s1670_s16 = sshll.u32 (!%p240_p10), %s1833_s24, 4  ;;  %s1783_s14 = scalar_lea.hbm (!%p240_p10), %s2391_s5, 32 }
  0x11   : > { %s1547_s19 = scalar_lea.hbm (!%p240_p10), %s2391_s5, %s1670_s16 }
  0x12   : > { %s1551_s27 = sshll.u32 (!%p240_p10), %s1547_s19, 4  ;;  %s1552_s27 = int_to_ptr.hbm [resolvable:$true] %s1551_s27 }
  0x14   : > { %v294_v0 = vld [vmem:[%s2387_s1] sm:$0xff]  ;;  %vm324_vm0 = vcmask 64512   ;;  %v299_v1 = vld [vmem:[%s2388_s2 + $0x8] sm:$0xff]  ;;  %v1843_v4 = vmov 0   ;;  %s1948_s17 = scalar_select %p278_p11, %s1833_s24, 1  ;;  %v296_v8 = vld [vmem:[%s2387_s1 + $0x10] sm:$0xff] }
  0x15   : > { %v295_v2 = vld [vmem:[%s2387_s1 + $0x8] sm:$0xff]  ;;  %v326_v3 = vsel %vm324_vm0, %v294_v0, 0  ;;  %1729 = vset.pattern.permute.xlu1 %v1843_v4  ;;  %1728 = vset.pattern.permute.xlu0 %v1843_v4  ;;  %v301_v9 = vld [vmem:[%s2388_s2 + $0x18] sm:$0xff]  ;;  %v332_v12 = vsel %vm324_vm0, %v296_v8, 0  ;;  %v298_v18 = vld [vmem:[%s2388_s2] sm:$0xff] }
  0x16   : > { %v329_v5 = vsel %vm324_vm0, %v295_v2, 0  ;;  %v1950_v6 = vand.u32 4294901760, %v326_v3  ;;  %311 = vperm.xlu1 %1729, %v299_v1   ;;  %1730 = vset.pattern.permute.xlu2 %v1843_v4  ;;  %s1669_s28 = sshll.u32 %s1948_s17, 4  ;;  %v1982_v21 = vand.u32 4294901760, %v332_v12  ;;  %v297_v25 = vld [vmem:[%s2387_s1 + $0x18] sm:$0xff]  ;;  %v300_v26 = vld [vmem:[%s2388_s2 + $0x10] sm:$0xff] }
  0x17   : > { %v1952_v7 = vand.u32 4294901760, %v329_v5  ;;  %321 = vperm.xlu0 %1728, %v301_v9   ;;  %s285_s11 = scalar_lea.vmem %s2386_s0, %s1669_s28  ;;  %v335_v33 = vsel %vm324_vm0, %v297_v25, 0  ;;  %s1663_s12 = sshll.u32 %s1948_s17, 3 }
  0x18   : > { %v1962_v10 = vsub.f32 %v326_v3, %v1950_v6  ;;  %v292_v13 = vld [vmem:[%s285_s11] sm:$0xff]  ;;  %v293_v15 = vld [vmem:[%s285_s11 + $0x8] sm:$0xff]  ;;  %v371_v30 = vsub.f32 %v332_v12, %v1982_v21  ;;  %v378_v38 = vand.u32 4294901760, %v335_v33  ;;  %s270_s11 = scalar_lea.vmem [#allocation2], %s1660_s8  ;;  %s2341_s15 = scalar_lea.vmem %s2392_s6, %s1663_s12 }
  0x19   : > { %v1965_v11 = vsub.f32 %v329_v5, %v1952_v7  ;;  %v352_v16 = vand.u32 4294901760, %v292_v13  ;;  %v591_v17 = vand.u32 4294901760, %v293_v15  ;;  %s1549_s20 = sshll.u32 %s270_s11, 4  ;;  %s1530_s28 = scalar_lea.sflag [#allocation3], %s268_s30  ;;  %s1550_s20 = int_to_ptr.vmem [resolvable:$true] %s1549_s20 }
  0x1a   : > { %v1972_v14 = vand.u32 4294901760, %v1962_v10  ;;  %v372_v37 = vand.u32 4294901760, %v371_v30  ;;  %v379_v40 = vsub.f32 %v335_v33, %v378_v38  ;;  %s1777_s8 = sshra.s32 %s1552_s27, 4  ;;  %s1778_s8 = int_to_ptr.hbm [resolvable:$true] %s1777_s8 }
  0x1b   : > { %v1980_v20 = vand.u32 4294901760, %v1965_v11  ;;  %353 = vmatpush.msra.mxu0 %v352_v16  ;;  %v403_v22 = vsub.f32 %v292_v13, %v352_v16  ;;  %480 = vmatpush.msra.mxu3 %v352_v16  ;;  %v642_v23 = vsub.f32 %v293_v15, %v591_v17  ;;  %s1779_s24 = scalar_lea.hbm %s1778_s8, 16  ;;  %p1784_p1 = scmp.lt.s32.totalorder %s1778_s8, %s2391_s5 }
  0x1c   : > { %v357_v19 = vsub.f32 %v1962_v10, %v1972_v14  ;;  %484 = vmatmul.f32.vlgmr.msra.gmra.mxu3 %v1972_v14  ;;  %v373_v39 = vsub.f32 %v371_v30, %v372_v37  ;;  %v380_v42 = vand.u32 4294901760, %v379_v40  ;;  %p1780_p12 = scmp.ne.s32.totalorder %s1778_s8, %s1779_s24  ;;  %p1785_p2 = scmp.lt.s32.totalorder %s1783_s14, %s1779_s24 }
  0x1d   : > { %442 = vmatpush.msra.mxu2 %v403_v22  ;;  %v404_v27 = vand.u32 4294901760, %v403_v22  ;;  %v643_v28 = vand.u32 4294901760, %v642_v23  ;;  %v365_v29 = vsub.f32 %v1965_v11, %v1980_v20 }
  0x1e   : > { %v358_v24 = vand.u32 4294901760, %v357_v19  ;;  %306 = vperm.xlu1 %1729, %v298_v18   ;;  %445 = vmatmul.f32.vlgmr.msra.gmra.mxu2 %v1962_v10  ;;  %v374_v41 = vand.u32 4294901760, %v373_v39  ;;  %v381_v43 = vsub.f32 %v379_v40, %v380_v42  ;;  %p1781_p13 = pnand %p1780_p12, %p1920_p4  ;;  %p1786_p3 = por %p1785_p2, %p1784_p1 }
  0x1f   : > { %316 = vperm.xlu0 %1728, %v300_v26   ;;  %592 = vmatpush.msrb.mxu2 %v591_v17  ;;  %v405_v31 = vsub.f32 %v403_v22, %v404_v27  ;;  %v644_v32 = vsub.f32 %v642_v23, %v643_v28  ;;  %v366_v36 = vand.u32 4294901760, %v365_v29 }
  0x20   : > { %359 = vmatmul.f32.vlgmr.msra.gmra.mxu0 %v358_v24  ;;  %v382_v44 = vand.u32 4294901760, %v381_v43  ;;  %p1782_p0 = pneg %p1781_p13 }
  0x21   : > { %524 = vmatpush.msrb.mxu0 %v404_v27  ;;  %763 = vmatpush.msra.mxu2 %v643_v28  ;;  %v406_v34 = vand.u32 4294901760, %v405_v31  ;;  %v645_v35 = vand.u32 4294901760, %v644_v32 }
  0x22   : > { %p1787_p5 = pnand %p1786_p3, %p1782_p0 }
  0x23   : > { %681 = vmatpush.msra.mxu0 %v642_v23  ;;  %407 = vmatpush.msra.mxu1 %v406_v34 }
  0x24   : > { %646 = vmatpush.msrb.mxu3 %v645_v35  ;;  %409 = vmatmul.f32.vlgmr.msra.gmra.mxu1 %v1950_v6 }
  0x25   : > { %490 = vmatmul.f32.gmra.mxu3 %v1980_v20  ;;  %558 = vmatpush.msrb.mxu1 %v352_v16 }
  0x26   : > { %797 = vmatpush.msra.mxu3 %v591_v17  ;;  %450 = vmatmul.f32.gmra.mxu2 %v1965_v11 }
  0x27   : > { %719 = vmatpush.msra.mxu1 %v591_v17 }
  0x28   : > { %367 = vmatmul.f32.gmra.mxu0 %v366_v36 }
  0x2c   : > { %413 = vmatmul.f32.gmra.mxu1 %v1952_v7 }
  0x2d   : > { %496 = vmatmul.f32.gmra.mxu3 %v372_v37 }
  0x2e   : > { %455 = vmatmul.f32.gmra.mxu2 %v371_v30 }
  0x30   : > { %375 = vmatmul.f32.gmra.mxu0 %v374_v41 }
  0x34   : > { %417 = vmatmul.f32.gmra.mxu1 %v1982_v21 }
  0x35   : > { %502 = vmatmul.f32.gmra.mxu3 %v380_v42 }
  0x36   : > { %460 = vmatmul.f32.gmra.mxu2 %v379_v40 }
  0x38   : > { %383 = vmatmul.f32.gmra.mxu0 %v382_v44 }
  0x3c   : > { %421 = vmatmul.f32.gmra.mxu1 %v378_v38 }
  0x3d   : > { %648 = vmatmul.f32.vlgmr.msrb.gmra.mxu3 %v1950_v6 }
  0x3e   : > { %598 = vmatmul.f32.vlgmr.msrb.gmra.mxu2 %v358_v24 }
  0x40   : > { %526 = vmatmul.f32.vlgmr.msrb.gmra.mxu0 %v1950_v6 }
  0x44   : > { %560 = vmatmul.f32.vlgmr.msrb.gmra.mxu1 %v1950_v6 }
  0x45   : > { %652 = vmatmul.f32.gmra.mxu3 %v1952_v7 }
  0x46   : > { %606 = vmatmul.f32.gmra.mxu2 %v366_v36 }
  0x48   : > { %530 = vmatmul.f32.gmra.mxu0 %v1952_v7 }
  0x4c   : > { %564 = vmatmul.f32.gmra.mxu1 %v1952_v7 }
  0x4d   : > { %656 = vmatmul.f32.gmra.mxu3 %v1982_v21 }
  0x4e   : > { %614 = vmatmul.f32.gmra.mxu2 %v374_v41 }
  0x50   : > { %534 = vmatmul.f32.gmra.mxu0 %v1982_v21 }
  0x54   : > { %568 = vmatmul.f32.gmra.mxu1 %v1982_v21 }
  0x55   : > { %660 = vmatmul.f32.gmra.mxu3 %v378_v38 }
  0x56   : > { %622 = vmatmul.f32.gmra.mxu2 %v382_v44 }
  0x58   : > { %538 = vmatmul.f32.gmra.mxu0 %v378_v38 }
  0x5c   : > { %572 = vmatmul.f32.gmra.mxu1 %v378_v38 }
  0x5d   : > { %799 = vmatmul.f32.vlgmr.msra.gmra.mxu3 %v1950_v6 }
  0x5e   : > { %765 = vmatmul.f32.vlgmr.msra.gmra.mxu2 %v1950_v6 }
  0x60   : > { %684 = vmatmul.f32.vlgmr.msra.gmra.mxu0 %v1962_v10 }
  0x64   : > { %723 = vmatmul.f32.vlgmr.msra.gmra.mxu1 %v1972_v14 }
  0x65   : > { %803 = vmatmul.f32.gmra.mxu3 %v1952_v7 }
  0x66   : > { %769 = vmatmul.f32.gmra.mxu2 %v1952_v7 }
  0x68   : > { %689 = vmatmul.f32.gmra.mxu0 %v1965_v11 }
  0x6c   : > { %729 = vmatmul.f32.gmra.mxu1 %v1980_v20 }
  0x6d   : > { %807 = vmatmul.f32.gmra.mxu3 %v1982_v21 }
  0x6e   : > { %773 = vmatmul.f32.gmra.mxu2 %v1982_v21 }
  0x70   : > { %694 = vmatmul.f32.gmra.mxu0 %v371_v30 }
  0x74   : > { %735 = vmatmul.f32.gmra.mxu1 %v372_v37 }
  0x75   : > { %811 = vmatmul.f32.gmra.mxu3 %v378_v38 }
  0x76   : > { %777 = vmatmul.f32.gmra.mxu2 %v378_v38 }
  0x78   : > { %699 = vmatmul.f32.gmra.mxu0 %v379_v40 }
  0x7c   : > { %741 = vmatmul.f32.gmra.mxu1 %v380_v42 }
  0x88   : > { %v2020_v50 = vpop.permute.xlu1 %311 }
  0x89   : > { %v2025_v61 = vpop.permute.xlu0 %321 }
  0x90   : > { %v2022_v55 = vpop.permute.xlu1 %306 }
  0x91   : > { %v2028_v7 = vpop.permute.xlu0 %316 }
  0x9d   : > { %v360_v45 = vpop.f32.mrf.mxu0 }
  0x9e   : > { %v361_v59 = vadd.f32 %v360_v45, %v2022_v55 }
  0x9f   : > { %v485_v46 = vpop.f32.mrf.mxu3 }
  0xa1   : > { %v410_v47 = vpop.f32.mrf.mxu1  ;;  %v446_v48 = vpop.f32.mrf.mxu2 }
  0xa2   : > { %v411_v62 = vadd.f32 %v410_v47, %v361_v59 }
  0xa4   : > { %v447_v2 = vadd.f32 %v446_v48, %v411_v62 }
  0xa5   : > { %v368_v49 = vpop.f32.mrf.mxu0 }
  0xa6   : > { %v369_v3 = vadd.f32 %v368_v49, %v2020_v50  ;;  %v486_v5 = vadd.f32 %v485_v46, %v447_v2 }
  0xa8   : > { %v491_v51 = vpop.f32.mrf.mxu3 }
  0xa9   : > { %v414_v52 = vpop.f32.mrf.mxu1  ;;  %v451_v53 = vpop.f32.mrf.mxu2 }
  0xaa   : > { %v415_v6 = vadd.f32 %v414_v52, %v369_v3 }
  0xac   : > { %v452_v12 = vadd.f32 %v451_v53, %v415_v6 }
  0xad   : > { %v376_v54 = vpop.f32.mrf.mxu0 }
  0xae   : > { %v377_v13 = vadd.f32 %v376_v54, %v2028_v7  ;;  %v492_v17 = vadd.f32 %v491_v51, %v452_v12 }
  0xb0   : > { %v497_v56 = vpop.f32.mrf.mxu3 }
  0xb1   : > { %v418_v57 = vpop.f32.mrf.mxu1  ;;  %v456_v58 = vpop.f32.mrf.mxu2 }
  0xb2   : > { %v419_v18 = vadd.f32 %v418_v57, %v377_v13 }
  0xb4   : > { %v457_v25 = vadd.f32 %v456_v58, %v419_v18 }
  0xb5   : > { %v384_v60 = vpop.f32.mrf.mxu0 }
  0xb6   : > { %v385_v26 = vadd.f32 %v384_v60, %v2025_v61  ;;  %v498_v31 = vadd.f32 %v497_v56, %v457_v25 }
  0xb8   : > { %v503_v63 = vpop.f32.mrf.mxu3 }
  0xb9   : > { %v422_v0 = vpop.f32.mrf.mxu1  ;;  %v461_v1 = vpop.f32.mrf.mxu2 }
  0xba   : > { %v423_v32 = vadd.f32 %v422_v0, %v385_v26 }
  0xbc   : > { %v462_v40 = vadd.f32 %v461_v1, %v423_v32 }
  0xbd   : > { %v527_v4 = vpop.f32.mrf.mxu0 }
  0xbe   : > { %v528_v9 = vadd.f32 %v527_v4, %v486_v5  ;;  %v504_v47 = vadd.f32 %v503_v63, %v462_v40 }
  0xc0   : > { %v2030_v8 = vpop.f32.mrf.mxu3 }
  0xc1   : > { %v561_v10 = vpop.f32.mrf.mxu1  ;;  %v599_v11 = vpop.f32.mrf.mxu2 }
  0xc2   : > { %v2033_v14 = vadd.f32 %v561_v10, %v528_v9  ;;  %v600_v2 = vadd.f32 %v599_v11, %v2022_v55 }
  0xc4   : > { %v2036_v16 = vmul.f32 0.70710677, %v2033_v14 }
  0xc5   : > { %v531_v15 = vpop.f32.mrf.mxu0 }
  0xc6   : > { %v2039_v19 = vand.u32 2147483647, %v2036_v16  ;;  %v532_v22 = vadd.f32 %v531_v15, %v492_v17  ;;  %v650_v15 = vadd.f32 %v2030_v8, %v600_v2 }
  0xc8   : > { %v2041_v20 = vpop.f32.mrf.mxu3  ;;  %v839_v21 = vmul.f32 0.3275911, %v2039_v19  ;;  %v1047_v9 = vsub.f32 0.0, %v2039_v19 }
  0xc9   : > { %v565_v23 = vpop.f32.mrf.mxu1  ;;  %v607_v24 = vpop.f32.mrf.mxu2 }
  0xca   : > { %v847_v27 = vadd.f32 1.0, %v839_v21  ;;  %v2045_v28 = vadd.f32 %v565_v23, %v532_v22  ;;  %v608_v55 = vadd.f32 %v607_v24, %v2020_v50  ;;  %v1055_v23 = vmul.f32 %v1047_v9, %v2039_v19 }
  0xcc   : > { %1731 = vrcp.f32 %v847_v27  ;;  %v2048_v30 = vmul.f32 0.70710677, %v2045_v28  ;;  %v866_v48 = vand.u32 2147483648, %v847_v27  ;;  %v864_v52 = vand.u32 2147483647, %v847_v27 }
  0xcd   : > { %v535_v29 = vpop.f32.mrf.mxu0  ;;  %vm860_vm2 = vweird.f32 %v847_v27  ;;  %v654_v19 = vadd.f32 %v2041_v20, %v608_v55 }
  0xce   : > { %v2051_v33 = vand.u32 2147483647, %v2048_v30  ;;  %v536_v35 = vadd.f32 %v535_v29, %v498_v31  ;;  %v867_v60 = vor.u32 1.1754944e-38, %v866_v48  ;;  %vm865_vm4 = vcmp.eq.f32.partialorder %v864_v52, 8.507059e+37 }
  0xd0   : > { %v2053_v34 = vpop.f32.mrf.mxu3  ;;  %v841_v36 = vmul.f32 0.3275911, %v2051_v33  ;;  %v1049_v8 = vsub.f32 0.0, %v2051_v33 }
  0xd1   : > { %v569_v37 = vpop.f32.mrf.mxu1  ;;  %v2056_v38 = vpop.f32.mrf.mxu2 }
  0xd2   : > { %v1732_v39 = vpop.eup %1731  ;;  %v2058_v41 = vadd.f32 %v569_v37, %v536_v35  ;;  %v849_v43 = vadd.f32 1.0, %v841_v36 }
  0xd3   : > { %v856_v42 = vmul.f32 %v1732_v39, %v847_v27  ;;  %vm861_vm1 = vweird.f32 %v1732_v39 }
  0xd4   : > { %v2061_v45 = vmul.f32 0.70710677, %v2058_v41  ;;  %1733 = vrcp.f32 %v849_v43  ;;  %vm862_vm3 = vmor %vm860_vm2, %vm861_vm1  ;;  %v896_v17 = vand.u32 2147483648, %v849_v43  ;;  %v894_v18 = vand.u32 2147483647, %v849_v43 }
  0xd5   : > { %v539_v44 = vpop.f32.mrf.mxu0  ;;  %v857_v46 = vsub.f32 1.0, %v856_v42  ;;  %vm890_vm6 = vweird.f32 %v849_v43 }
  0xd6   : > { %v2064_v49 = vand.u32 2147483647, %v2061_v45  ;;  %v540_v54 = vadd.f32 %v539_v44, %v504_v47  ;;  %v897_v32 = vor.u32 1.1754944e-38, %v896_v17  ;;  %vm895_vm8 = vcmp.eq.f32.partialorder %v894_v18, 8.507059e+37 }
  0xd7   : > { %v858_v51 = vmul.f32 %v1732_v39, %v857_v46 }
  0xd8   : > { %v843_v53 = vmul.f32 0.3275911, %v2064_v49  ;;  %v2067_v56 = vpop.f32.mrf.mxu3 }
  0xd9   : > { %v859_v57 = vadd.f32 %v1732_v39, %v858_v51  ;;  %v573_v58 = vpop.f32.mrf.mxu1  ;;  %v2069_v59 = vpop.f32.mrf.mxu2  ;;  %v1057_v51 = vmul.f32 %v1049_v8, %v2051_v33 }
  0xda   : > { %v2071_v62 = vadd.f32 1.0, %v843_v53  ;;  %v2073_v63 = vadd.f32 %v573_v58, %v540_v54  ;;  %v1734_v0 = vpop.eup %1733 }
  0xdb   : > { %v863_v1 = vsel %vm862_vm3, %v1732_v39, %v859_v57  ;;  %v886_v5 = vmul.f32 %v1734_v0, %v849_v43  ;;  %vm891_vm5 = vweird.f32 %v1734_v0  ;;  %v1063_v57 = vmul.f32 1.442695, %v1055_v23 }
  0xdc   : > { %v2076_v4 = vsel %vm865_vm4, %v867_v60, %v863_v1  ;;  %1735 = vrcp.f32 %v2071_v62  ;;  %v2082_v12 = vmul.f32 0.70710677, %v2073_v63  ;;  %vm892_vm7 = vmor %vm890_vm6, %vm891_vm5  ;;  %v926_v52 = vand.u32 2147483648, %v2071_v62 }
  0xdd   : > { %v685_v3 = vpop.f32.mrf.mxu0  ;;  %v975_v6 = vmul.f32 1.0614054, %v2076_v4  ;;  %v887_v10 = vsub.f32 1.0, %v886_v5  ;;  %v924_v20 = vand.u32 2147483647, %v2071_v62  ;;  %vm920_vm10 = vweird.f32 %v2071_v62 }
  0xde   : > { %v2087_v21 = vand.u32 2147483647, %v2082_v12  ;;  %v686_v25 = vadd.f32 %v685_v3, %v650_v15  ;;  %v616_v1 = vadd.f32 %v2056_v38, %v2028_v7  ;;  %v927_v9 = vor.u32 1.1754944e-38, %v926_v52 }
  0xdf   : > { %v983_v13 = vadd.f32 -1.4531521, %v975_v6  ;;  %v888_v11 = vmul.f32 %v1734_v0, %v887_v10  ;;  %vm925_vm12 = vcmp.eq.f32.partialorder %v924_v20, 8.507059e+37  ;;  %v1051_v7 = vsub.f32 0.0, %v2064_v49 }
  0xe0   : > { %v845_v50 = vmul.f32 0.3275911, %v2087_v21  ;;  %v800_v39 = vpop.f32.mrf.mxu3  ;;  %vm1095_vm5 = vcmp.ge.f32.partialorder %v2036_v16, 0.0  ;;  %vm1097_vm6 = vcmp.ge.f32.partialorder %v2048_v30, 0.0  ;;  %v817_v16 = vmul.f32 0.5, %v2045_v28 }
  0xe1   : > { %v991_v22 = vmul.f32 %v983_v13, %v2076_v4  ;;  %v724_v26 = vpop.f32.mrf.mxu1  ;;  %v766_v27 = vpop.f32.mrf.mxu2  ;;  %v889_v31 = vadd.f32 %v1734_v0, %v888_v11  ;;  %v1067_v13 = vmul.f32 1.442695, %v1057_v51  ;;  %v819_v30 = vmul.f32 0.5, %v2058_v41 }
  0xe2   : > { %v1736_v29 = vpop.eup %1735  ;;  %v725_v36 = vadd.f32 %v724_v26, %v686_v25  ;;  %v2095_v42 = vadd.f32 1.0, %v845_v50 }
  0xe3   : > { %v999_v24 = vadd.f32 1.4214138, %v991_v22  ;;  %v916_v35 = vmul.f32 %v1736_v29, %v2071_v62  ;;  %v893_v40 = vsel %vm892_vm7, %v1734_v0, %v889_v31  ;;  %vm921_vm9 = vweird.f32 %v1736_v29 }
  0xe4   : > { %v2098_v44 = vsel %vm895_vm8, %v897_v32, %v893_v40  ;;  %v767_v47 = vadd.f32 %v766_v27, %v725_v36  ;;  %1737 = vrcp.f32 %v2095_v42  ;;  %vm922_vm11 = vmor %vm920_vm10, %vm921_vm9  ;;  %v956_v36 = vand.u32 2147483648, %v2095_v42 }
  0xe5   : > { %v690_v37 = vpop.f32.mrf.mxu0  ;;  %v1007_v43 = vmul.f32 %v999_v24, %v2076_v4  ;;  %v917_v46 = vsub.f32 1.0, %v916_v35  ;;  %v977_v48 = vmul.f32 1.0614054, %v2098_v44  ;;  %1739 = vpow2.f32 %v1063_v57 }
  0xe6   : > { %v2105_v60 = vadd.f32 %v800_v39, %v767_v47  ;;  %v691_v33 = vadd.f32 %v690_v37, %v654_v19  ;;  %1741 = vpow2.f32 %v1067_v13  ;;  %v1059_v35 = vmul.f32 %v1051_v7, %v2064_v49 }
  0xe7   : > { %v1015_v53 = vadd.f32 -0.28449672, %v1007_v43  ;;  %v918_v54 = vmul.f32 %v1736_v29, %v917_v46  ;;  %v985_v58 = vadd.f32 -1.4531521, %v977_v48  ;;  %v954_v19 = vand.u32 2147483647, %v2095_v42 }
  0xe8   : > { %v2113_v10 = vmul.f32 0.70710677, %v2105_v60  ;;  %v804_v25 = vpop.f32.mrf.mxu3  ;;  %v624_v47 = vadd.f32 %v2069_v59, %v2025_v61  ;;  %vm950_vm14 = vweird.f32 %v2095_v42  ;;  %v1071_v20 = vmul.f32 1.442695, %v1059_v35 }
  0xe9   : > { %v919_v0 = vadd.f32 %v1736_v29, %v918_v54  ;;  %v730_v2 = vpop.f32.mrf.mxu1  ;;  %v770_v3 = vpop.f32.mrf.mxu2  ;;  %v1023_v5 = vmul.f32 %v1015_v53, %v2076_v4  ;;  %v993_v6 = vmul.f32 %v985_v58, %v2098_v44  ;;  %v1053_v57 = vsub.f32 0.0, %v2087_v21 }
  0xea   : > { %v731_v17 = vadd.f32 %v730_v2, %v691_v33  ;;  %v1738_v62 = vpop.eup %1737  ;;  %v2119_v38 = vand.u32 2147483647, %v2113_v10  ;;  %vm955_vm0 = vcmp.eq.f32.partialorder %v954_v19, 8.507059e+37  ;;  %vm1099_vm7 = vcmp.ge.f32.partialorder %v2061_v45, 0.0 }
  0xeb   : > { %v923_v15 = vsel %vm922_vm11, %v1736_v29, %v919_v0  ;;  %v1001_v55 = vadd.f32 1.4214138, %v993_v6  ;;  %v946_v22 = vmul.f32 %v1738_v62, %v2095_v42  ;;  %v1031_v26 = vadd.f32 0.2548296, %v1023_v5  ;;  %v1740_v49 = vpop.eup %1739 }
  0xec   : > { %v2115_v11 = vsel %vm925_vm12, %v927_v9, %v923_v15  ;;  %v658_v29 = vadd.f32 %v2053_v34, %v616_v1  ;;  %v840_v31 = vmul.f32 0.3275911, %v2119_v38  ;;  %v771_v24 = vadd.f32 %v770_v3, %v731_v17  ;;  %v1742_v58 = vpop.eup %1741 }
  0xed   : > { %v979_v18 = vmul.f32 1.0614054, %v2115_v11  ;;  %v695_v23 = vpop.f32.mrf.mxu0  ;;  %v1009_v27 = vmul.f32 %v1001_v55, %v2098_v44  ;;  %v947_v50 = vsub.f32 1.0, %v946_v22  ;;  %vm951_vm13 = vweird.f32 %v1738_v62 }
  0xee   : > { %v2128_v37 = vadd.f32 1.0, %v840_v31  ;;  %v1039_v43 = vmul.f32 %v1031_v26, %v2076_v4  ;;  %v2138_v52 = vadd.f32 %v804_v25, %v771_v24  ;;  %vm952_vm15 = vmor %vm950_vm14, %vm951_vm13  ;;  %v957_v4 = vor.u32 1.1754944e-38, %v956_v36 }
  0xef   : > { %v987_v8 = vadd.f32 -1.4531521, %v979_v18  ;;  %v1017_v32 = vadd.f32 -0.28449672, %v1009_v27  ;;  %v948_v40 = vmul.f32 %v1738_v62, %v947_v50  ;;  %v696_v33 = vadd.f32 %v695_v23, %v658_v29 }
  0xf0   : > { %1743 = vrcp.f32 %v2128_v37  ;;  %v2143_v0 = vmul.f32 %v1740_v49, %v1039_v43  ;;  %v2150_v5 = vmul.f32 0.70710677, %v2138_v52  ;;  %v808_v9 = vpop.f32.mrf.mxu3  ;;  %v1061_v15 = vmul.f32 %v1053_v57, %v2087_v21 }
  0xf1   : > { %v995_v39 = vmul.f32 %v987_v8, %v2115_v11  ;;  %v736_v34 = vpop.f32.mrf.mxu1  ;;  %v1025_v46 = vmul.f32 %v1017_v32, %v2098_v44  ;;  %v949_v51 = vadd.f32 %v1738_v62, %v948_v40  ;;  %v774_v53 = vpop.f32.mrf.mxu2  ;;  %1745 = vpow2.f32 %v1071_v20 }
  0xf2   : > { %v662_v17 = vadd.f32 %v2067_v56, %v624_v47  ;;  %v1087_v23 = vsub.f32 1.0, %v2143_v0  ;;  %v879_v25 = vand.u32 2147483647, %v2128_v37  ;;  %v2159_v26 = vand.u32 2147483647, %v2150_v5 }
  0xf3   : > { %v1003_v48 = vadd.f32 1.4214138, %v995_v39  ;;  %v1033_v54 = vadd.f32 0.2548296, %v1025_v46  ;;  %v953_v59 = vsel %vm952_vm15, %v1738_v62, %v949_v51  ;;  %v737_v62 = vadd.f32 %v736_v34, %v696_v33 }
  0xf4   : > { %v2146_v42 = vsel %vm955_vm0, %v957_v4, %v953_v59  ;;  %v881_v31 = vand.u32 2147483648, %v2128_v37  ;;  %v842_v8 = vmul.f32 0.3275911, %v2159_v26  ;;  %v1103_v34 = vsub.f32 0.0, %v1087_v23 }
  0xf5   : > { %v1011_v61 = vmul.f32 %v1003_v48, %v2115_v11  ;;  %v1041_v1 = vmul.f32 %v1033_v54, %v2098_v44  ;;  %v981_v3 = vmul.f32 1.0614054, %v2146_v42  ;;  %v700_v6 = vpop.f32.mrf.mxu0  ;;  %v775_v50 = vadd.f32 %v774_v53, %v737_v62 }
  0xf6   : > { %v1744_v13 = vpop.eup %1743  ;;  %v701_v27 = vadd.f32 %v700_v6, %v662_v17  ;;  %v1075_v43 = vmul.f32 1.442695, %v1061_v15  ;;  %vm875_vm2 = vweird.f32 %v2128_v37  ;;  %v2166_v46 = vadd.f32 1.0, %v842_v8 }
  0xf7   : > { %v1019_v2 = vadd.f32 -0.28449672, %v1011_v61  ;;  %v1081_v55 = vmul.f32 %v1742_v58, %v1041_v1  ;;  %v989_v7 = vadd.f32 -1.4531521, %v981_v3  ;;  %v871_v18 = vmul.f32 %v1744_v13, %v2128_v37  ;;  %v1746_v19 = vpop.eup %1745 }
  0xf8   : > { %vm876_vm1 = vweird.f32 %v1744_v13  ;;  %vm880_vm3 = vcmp.eq.f32.partialorder %v879_v25, 8.507059e+37  ;;  %v882_v51 = vor.u32 1.1754944e-38, %v881_v31  ;;  %1747 = vrcp.f32 %v2166_v46  ;;  %v812_v37 = vpop.f32.mrf.mxu3 }
  0xf9   : > { %v1027_v44 = vmul.f32 %v1019_v2, %v2115_v11  ;;  %v742_v22 = vpop.f32.mrf.mxu1  ;;  %v997_v21 = vmul.f32 %v989_v7, %v2146_v42  ;;  %v872_v56 = vsub.f32 1.0, %v871_v18  ;;  %v1089_v32 = vsub.f32 1.0, %v1081_v55  ;;  %v778_v40 = vpop.f32.mrf.mxu2  ;;  %vm877_vm4 = vmor %vm875_vm2, %vm876_vm1 }
  0xfa   : > { %v743_v24 = vadd.f32 %v742_v22, %v701_v27  ;;  %v815_v58 = vmul.f32 0.5, %v2033_v14  ;;  %1749 = vpow2.f32 %v1075_v43  ;;  %v1111_v14 = vsel %vm1095_vm5, %v1087_v23, %v1103_v34 }
  0xfb   : > { %v1035_v29 = vadd.f32 0.2548296, %v1027_v44  ;;  %v1005_v36 = vadd.f32 1.4214138, %v997_v21  ;;  %v873_v39 = vmul.f32 %v1744_v13, %v872_v56  ;;  %v1105_v54 = vsub.f32 0.0, %v1089_v32 }
  0xfc   : > { %v779_v53 = vadd.f32 %v778_v40, %v743_v24  ;;  %v821_v45 = vmul.f32 0.5, %v2073_v63  ;;  %v1119_v18 = vadd.f32 1.0, %v1111_v14  ;;  %v1048_v27 = vsub.f32 0.0, %v2119_v38 }
  0xfd   : > { %v1043_v35 = vmul.f32 %v1035_v29, %v2115_v11  ;;  %v1013_v49 = vmul.f32 %v1005_v36, %v2146_v42  ;;  %v874_v48 = vadd.f32 %v1744_v13, %v873_v39  ;;  %v2171_v11 = vadd.f32 %v808_v9, %v775_v50 }
  0xfe   : > { %v2184_v2 = vadd.f32 %v812_v37, %v779_v53  ;;  %v1113_v3 = vsel %vm1097_vm6, %v1089_v32, %v1105_v54  ;;  %v911_v41 = vand.u32 2147483648, %v2166_v46  ;;  %v909_v50 = vand.u32 2147483647, %v2166_v46 }
  0xff   : > { %v1083_v47 = vmul.f32 %v1746_v19, %v1043_v35  ;;  %v1021_v4 = vadd.f32 -0.28449672, %v1013_v49  ;;  %v878_v57 = vsel %vm877_vm4, %v1744_v13, %v874_v48  ;;  %v2182_v33 = vmul.f32 0.70710677, %v2171_v11  ;;  %v1748_v13 = vpop.eup %1747 }
 0x100   : > { %v2174_v61 = vsel %vm880_vm3, %v882_v51, %v878_v57  ;;  %v901_v44 = vmul.f32 %v1748_v13, %v2166_v46  ;;  %v1750_v7 = vpop.eup %1749  ;;  %v1121_v22 = vadd.f32 1.0, %v1113_v3  ;;  %v2196_v28 = vmul.f32 0.70710677, %v2184_v2 }
 0x101   : > { %v1091_v20 = vsub.f32 1.0, %v1083_v47  ;;  %v1029_v0 = vmul.f32 %v1021_v4, %v2146_v42  ;;  %v976_v1 = vmul.f32 1.0614054, %v2174_v61  ;;  %v2188_v62 = vand.u32 2147483647, %v2182_v33 }
 0x102   : > { %v902_v29 = vsub.f32 1.0, %v901_v44  ;;  %v2204_v56 = vand.u32 2147483647, %v2196_v28  ;;  %vm906_vm8 = vweird.f32 %v1748_v13  ;;  %v1127_v24 = vmul.f32 %v1119_v18, %v815_v58 }
 0x103   : > { %v1107_v59 = vsub.f32 0.0, %v1091_v20  ;;  %v1037_v9 = vadd.f32 0.2548296, %v1029_v0  ;;  %v984_v17 = vadd.f32 -1.4531521, %v976_v1  ;;  %v1129_v32 = vmul.f32 %v1121_v22, %v817_v16 }
 0x104   : > { %v844_v23 = vmul.f32 0.3275911, %v2188_v62  ;;  %v903_v8 = vmul.f32 %v1748_v13, %v902_v29  ;;  %vm1101_vm9 = vcmp.ge.f32.partialorder %v2082_v12, 0.0  ;;  %vm905_vm10 = vweird.f32 %v2166_v46 }
 0x105   : > { %v1115_v6 = vsel %vm1099_vm7, %v1091_v20, %v1107_v59  ;;  %v1045_v55 = vmul.f32 %v1037_v9, %v2146_v42  ;;  %v992_v63 = vmul.f32 %v984_v17, %v2174_v61  ;;  %v1050_v39 = vsub.f32 0.0, %v2159_v26  ;;  %vm907_vm11 = vmor %vm905_vm10, %vm906_vm8 }
 0x106   : > { %v1123_v15 = vadd.f32 1.0, %v1115_v6  ;;  %v2201_v42 = vadd.f32 1.0, %v844_v23  ;;  %v904_v36 = vadd.f32 %v1748_v13, %v903_v8  ;;  %v912_v34 = vor.u32 1.1754944e-38, %v911_v41 }
 0x107   : > { %v1085_v25 = vmul.f32 %v1750_v7, %v1045_v55  ;;  %v1000_v19 = vadd.f32 1.4214138, %v992_v63  ;;  %v846_v43 = vmul.f32 0.3275911, %v2204_v56  ;;  %v1056_v49 = vmul.f32 %v1048_v27, %v2119_v38 }
 0x108   : > { %v1131_v21 = vmul.f32 %v1123_v15, %v819_v30  ;;  %1751 = vrcp.f32 %v2201_v42  ;;  %v908_v48 = vsel %vm907_vm11, %v1748_v13, %v904_v36  ;;  %vm910_vm12 = vcmp.eq.f32.partialorder %v909_v50, 8.507059e+37 }
 0x109   : > { %v1093_v31 = vsub.f32 1.0, %v1085_v25  ;;  %v2215_v12 = vand.u32 4294901760, %v1129_v32  ;;  %v2217_v53 = vsel %vm910_vm12, %v912_v34, %v908_v48  ;;  %v2219_v46 = vadd.f32 1.0, %v846_v43 }
 0x10a   : > { %v2211_v40 = vand.u32 4294901760, %v1131_v21  ;;  %v2221_v54 = vand.u32 4294901760, %v1127_v24  ;;  %v978_v20 = vmul.f32 1.0614054, %v2217_v53  ;;  %v1058_v4 = vmul.f32 %v1050_v39, %v2159_v26 }
 0x10b   : > { %v1109_v35 = vsub.f32 0.0, %v1093_v31  ;;  %v1008_v58 = vmul.f32 %v1000_v19, %v2174_v61  ;;  %1753 = vrcp.f32 %v2219_v46  ;;  %v2233_v14 = vmul.f32 1.442695, %v1056_v49 }
 0x10c   : > { %v2228_v38 = vsub.f32 %v1131_v21, %v2211_v40  ;;  %v986_v59 = vadd.f32 -1.4531521, %v978_v20  ;;  %v939_v3 = vand.u32 2147483647, %v2201_v42  ;;  %v2237_v26 = vsub.f32 %v1129_v32, %v2215_v12 }
 0x10d   : > { %v1117_v47 = vsel %vm1101_vm9, %v1093_v31, %v1109_v35  ;;  %v1069_v9 = vmul.f32 1.442695, %v1058_v4  ;;  %v941_v16 = vand.u32 2147483648, %v2201_v42  ;;  %v1016_v17 = vadd.f32 -0.28449672, %v1008_v58 }
 0x10e   : > { %v1125_v51 = vadd.f32 1.0, %v1117_v47  ;;  %v1752_v57 = vpop.eup %1751  ;;  %v994_v6 = vmul.f32 %v986_v59, %v2217_v53  ;;  %v2245_v30 = vsub.f32 %v1127_v24, %v2221_v54  ;;  %v1052_v7 = vsub.f32 0.0, %v2188_v62 }
 0x10f   : > { %v931_v0 = vmul.f32 %v1752_v57, %v2201_v42  ;;  %vm936_vm13 = vweird.f32 %v1752_v57  ;;  %vm935_vm14 = vweird.f32 %v2201_v42  ;;  %vm2250_vm15 = vcmp.eq.f32.partialorder %v939_v3, 8.507059e+37 }
 0x110   : > { %v1133_v37 = vmul.f32 %v1125_v51, %v821_v45  ;;  %v1193_v45 = vand.u32 4294901760, %v2228_v38  ;;  %v1002_v55 = vadd.f32 1.4214138, %v994_v6  ;;  %v1199_v25 = vand.u32 4294901760, %v2237_v26  ;;  %vm937_vm0 = vmor %vm935_vm14, %vm936_vm13 }
 0x111   : > { %v932_v13 = vsub.f32 1.0, %v931_v0  ;;  %v1754_v18 = vpop.eup %1753  ;;  %v942_v41 = vor.u32 1.1754944e-38, %v941_v16  ;;  %v1024_v63 = vmul.f32 %v1016_v17, %v2174_v61  ;;  %v1205_v8 = vand.u32 4294901760, %v2245_v30 }
 0x112   : > { %v2231_v1 = vand.u32 4294901760, %v1133_v37  ;;  %v1010_v27 = vmul.f32 %v1002_v55, %v2217_v53  ;;  %v961_v21 = vmul.f32 %v1754_v18, %v2219_v46  ;;  %v1194_v31 = vsub.f32 %v2228_v38, %v1193_v45 }
 0x113   : > { %v933_v44 = vmul.f32 %v1752_v57, %v932_v13  ;;  %v969_v35 = vand.u32 2147483647, %v2219_v46  ;;  %v971_v39 = vand.u32 2147483648, %v2219_v46  ;;  %v1200_v34 = vsub.f32 %v2237_v26, %v1199_v25 }
 0x114   : > { %v1186_v15 = vsub.f32 %v1133_v37, %v2231_v1  ;;  %1157 = vmatpush.msrb.mxu0 %v2231_v1  ;;  %1257 = vmatpush.msrb.mxu3 %v2231_v1  ;;  %v1018_v50 = vadd.f32 -0.28449672, %v1010_v27  ;;  %v962_v32 = vsub.f32 1.0, %v961_v21  ;;  %vm966_vm1 = vweird.f32 %v1754_v18 }
 0x115   : > { %v934_v29 = vadd.f32 %v1752_v57, %v933_v44  ;;  %v1032_v48 = vadd.f32 0.2548296, %v1024_v63  ;;  %1755 = vpow2.f32 %v1069_v9  ;;  %v1195_v51 = vand.u32 4294901760, %v1194_v31 }
 0x116   : > { %1159 = vmatpush.msrb.mxu0 %v2211_v40  ;;  %1228 = vmatpush.msrb.mxu2 %v1186_v15  ;;  %v1187_v23 = vand.u32 4294901760, %v1186_v15  ;;  %v1026_v43 = vmul.f32 %v1018_v50, %v2217_v53  ;;  %v963_v49 = vmul.f32 %v1754_v18, %v962_v32  ;;  %v1206_v20 = vsub.f32 %v2245_v30, %v1205_v8 }
 0x117   : > { %1259 = vmatpush.msrb.mxu3 %v2211_v40  ;;  %v938_v24 = vsel %vm937_vm0, %v1752_v57, %v934_v29  ;;  %vm965_vm2 = vweird.f32 %v2219_v46  ;;  %1757 = vpow2.f32 %v2233_v14  ;;  %v1060_v58 = vmul.f32 %v1052_v7, %v2188_v62  ;;  %v302_v62 = vld [vmem:[%s2389_s3] sm:$0xff] }
 0x118   : > { %1161 = vmatpush.msrb.mxu0 %v2215_v12  ;;  %1231 = vmatpush.msrb.mxu2 %v2228_v38  ;;  %v1188_v42 = vsub.f32 %v1186_v15, %v1187_v23  ;;  %v2269_v36 = vsel %vm2250_vm15, %v942_v41, %v938_v24  ;;  %v1034_v4 = vadd.f32 0.2548296, %v1026_v43  ;;  %v964_v37 = vadd.f32 %v1754_v18, %v963_v49  ;;  %vm967_vm3 = vmor %vm965_vm2, %vm966_vm1 }
 0x119   : > { %1261 = vmatpush.msrb.mxu3 %v2215_v12  ;;  %v980_v47 = vmul.f32 1.0614054, %v2269_v36  ;;  %v972_v38 = vor.u32 1.1754944e-38, %v971_v39  ;;  %v1201_v59 = vand.u32 4294901760, %v1200_v34  ;;  %vm970_vm4 = vcmp.eq.f32.partialorder %v969_v35, 8.507059e+37 }
 0x11a   : > { %1163 = vmatpush.msrb.mxu0 %v2221_v54  ;;  %1234 = vmatpush.msrb.mxu2 %v2237_v26  ;;  %v1189_v19 = vand.u32 4294901760, %v1188_v42  ;;  %v1042_v0 = vmul.f32 %v1034_v4, %v2217_v53  ;;  %v968_v26 = vsel %vm967_vm3, %v1754_v18, %v964_v37  ;;  %v1054_v46 = vsub.f32 0.0, %v2204_v56 }
 0x11b   : > { %1263 = vmatpush.msrb.mxu3 %v2221_v54  ;;  %v988_v57 = vadd.f32 -1.4531521, %v980_v47  ;;  %v973_v6 = vsel %vm970_vm4, %v972_v38, %v968_v26  ;;  %v1207_v9 = vand.u32 4294901760, %v1206_v20  ;;  %vm1140_vm5 = vcmask 261120   ;;  %v1756_v15 = vpop.eup %1755 }
 0x11c   : > { %1286 = vmatpush.msra.mxu0 %v1187_v23  ;;  %1190 = vmatpush.msrb.mxu1 %v1189_v19  ;;  %v1040_v14 = vmul.f32 %v1032_v48, %v2174_v61  ;;  %v982_v16 = vmul.f32 1.0614054, %v973_v6  ;;  %v1142_v53 = vsel %vm1140_vm5, %v302_v62, 0  ;;  %v1073_v17 = vmul.f32 1.442695, %v1060_v58 }
 0x11d   : > { %1237 = vmatpush.msrb.mxu2 %v2245_v30  ;;  %v996_v3 = vmul.f32 %v988_v57, %v2269_v36  ;;  %v2291_v30 = vand.u32 4294901760, %v1142_v53  ;;  %v1758_v7 = vpop.eup %1757  ;;  %v1062_v18 = vmul.f32 %v1054_v46, %v2204_v56  ;;  %vm1098_vm6 = vcmp.ge.f32.partialorder %v2150_v5, 0.0 }
 0x11e   : > { %1290 = vmatpush.msra.mxu0 %v1193_v45  ;;  %1196 = vmatpush.msrb.mxu1 %v1195_v51  ;;  %v1082_v45 = vmul.f32 %v1756_v15, %v1042_v0  ;;  %v990_v44 = vadd.f32 -1.4531521, %v982_v16  ;;  %v1080_v22 = vmul.f32 %v1758_v7, %v1040_v14  ;;  %1759 = vpow2.f32 %v1073_v17 }
 0x11f   : > { %v1004_v13 = vadd.f32 1.4214138, %v996_v3  ;;  %v2298_v61 = vsub.f32 %v1142_v53, %v2291_v30  ;;  %v1077_v41 = vmul.f32 1.442695, %v1062_v18  ;;  %vm1096_vm7 = vcmp.ge.f32.partialorder %v2113_v10, 0.0 }
 0x120   : > { %1294 = vmatpush.msra.mxu0 %v1199_v25  ;;  %1202 = vmatpush.msrb.mxu1 %v1201_v59  ;;  %v998_v25 = vmul.f32 %v990_v44, %v973_v6  ;;  %v1088_v63 = vsub.f32 1.0, %v1080_v22  ;;  %vm1100_vm8 = vcmp.ge.f32.partialorder %v2182_v33, 0.0  ;;  %v818_v57 = vmul.f32 0.5, %v2138_v52  ;;  %v303_v33 = vld [vmem:[%s2390_s4] sm:$0xff] }
 0x121   : > { %v1012_v55 = vmul.f32 %v1004_v13, %v2269_v36  ;;  %v2302_v27 = vand.u32 4294901760, %v2298_v61  ;;  %1240 = vmatmul.f32.vlgmr.msrb.gmra.mxu2 %v2298_v61  ;;  %1761 = vpow2.f32 %v1077_v41  ;;  %v820_v37 = vmul.f32 0.5, %v2171_v11  ;;  %1137 = vperm.xlu2 %1730, %v303_v33  }
 0x122   : > { %1298 = vmatpush.msra.mxu0 %v1205_v8  ;;  %1208 = vmatpush.msrb.mxu1 %v1207_v9  ;;  %v1006_v56 = vadd.f32 1.4214138, %v998_v25  ;;  %v816_v10 = vmul.f32 0.5, %v2105_v60  ;;  %vm1102_vm9 = vcmp.ge.f32.partialorder %v2196_v28, 0.0  ;;  %vm1520_vm10 = vcmask 7168  }
 0x123   : > { %1210 = vmatmul.f32.vlgmr.msrb.gmra.mxu1 %v2291_v30  ;;  %v1020_v23 = vadd.f32 -0.28449672, %v1012_v55  ;;  %v1167_v21 = vsub.f32 %v2298_v61, %v2302_v27  ;;  %1267 = vmatmul.f32.vlgmr.msrb.gmra.mxu3 %v2302_v27 }
 0x124   : > { %1317 = vmatpush.msra.mxu1 %v2231_v1  ;;  %v1090_v1 = vsub.f32 1.0, %v1082_v45  ;;  %v1014_v42 = vmul.f32 %v1006_v56, %v973_v6  ;;  %v1760_v32 = vpop.eup %1759 }
 0x125   : > { %v1028_v29 = vmul.f32 %v1020_v23, %v2269_v36  ;;  %v2311_v31 = vand.u32 4294901760, %v1167_v21 }
 0x126   : > { %1319 = vmatpush.msra.mxu1 %v2211_v40  ;;  %v1106_v8 = vsub.f32 0.0, %v1090_v1  ;;  %v1022_v24 = vadd.f32 -0.28449672, %v1014_v42 }
 0x127   : > { %v1036_v40 = vadd.f32 0.2548296, %v1028_v29  ;;  %1169 = vmatmul.f32.vlgmr.msrb.gmra.mxu0 %v2311_v31  ;;  %v1762_v49 = vpop.eup %1761 }
 0x128   : > { %1321 = vmatpush.msra.mxu1 %v2215_v12  ;;  %v1104_v12 = vsub.f32 0.0, %v1088_v63  ;;  %v1030_v39 = vmul.f32 %v1022_v24, %v973_v6  ;;  %v1114_v19 = vsel %vm1098_vm6, %v1090_v1, %v1106_v8 }
 0x129   : > { %v1044_v50 = vmul.f32 %v1036_v40, %v2269_v36  ;;  %v1122_v48 = vadd.f32 1.0, %v1114_v19 }
 0x12a   : > { %1323 = vmatpush.msra.mxu1 %v2221_v54  ;;  %v1038_v54 = vadd.f32 0.2548296, %v1030_v39  ;;  %v1112_v43 = vsel %vm1096_vm7, %v1088_v63, %v1104_v12 }
 0x12b   : > { %1325 = vmatmul.f32.vlgmr.msra.gmra.mxu1 %v2291_v30  ;;  %v1084_v35 = vmul.f32 %v1760_v32, %v1044_v50  ;;  %v1120_v4 = vadd.f32 1.0, %v1112_v43  ;;  %v1130_v38 = vmul.f32 %v1122_v48, %v818_v57 }
 0x12c   : > { %v1046_v36 = vmul.f32 %v1038_v54, %v973_v6  ;;  %v822_v6 = vmul.f32 0.5, %v2184_v2 }
 0x12d   : > { %v1092_v34 = vsub.f32 1.0, %v1084_v35  ;;  %v1128_v3 = vmul.f32 %v1120_v4, %v816_v10  ;;  %v1345_v11 = vand.u32 4294901760, %v1130_v38 }
 0x12e   : > { %v1086_v20 = vmul.f32 %v1762_v49, %v1046_v36 }
 0x12f   : > { %v1108_v47 = vsub.f32 0.0, %v1092_v34  ;;  %1300 = vmatmul.f32.vlgmr.msra.gmra.mxu0 %v2291_v30  ;;  %v1347_v9 = vand.u32 4294901760, %v1128_v3  ;;  %v1383_v13 = vsub.f32 %v1130_v38, %v1345_v11 }
 0x130   : > { %v1094_v58 = vsub.f32 1.0, %v1086_v20 }
 0x131   : > { %v1116_v51 = vsel %vm1100_vm8, %v1092_v34, %v1108_v47  ;;  %v1389_v53 = vsub.f32 %v1128_v3, %v1347_v9  ;;  %v1384_v28 = vand.u32 4294901760, %v1383_v13 }
 0x132   : > { %v1124_v5 = vadd.f32 1.0, %v1116_v51  ;;  %v1110_v0 = vsub.f32 0.0, %v1094_v58 }
 0x133   : > { %v1390_v55 = vand.u32 4294901760, %v1389_v53  ;;  %v1385_v7 = vsub.f32 %v1383_v13, %v1384_v28 }
 0x134   : > { %v1132_v59 = vmul.f32 %v1124_v5, %v820_v37  ;;  %v1118_v52 = vsel %vm1102_vm9, %v1094_v58, %v1110_v0 }
 0x135   : > { %v1126_v46 = vadd.f32 1.0, %v1118_v52  ;;  %v1391_v22 = vsub.f32 %v1389_v53, %v1390_v55  ;;  %v1386_v23 = vand.u32 4294901760, %v1385_v7 }
 0x136   : > { %v1343_v26 = vand.u32 4294901760, %v1132_v59 }
 0x137   : > { %v1134_v62 = vmul.f32 %v1126_v46, %v822_v6  ;;  %v1392_v25 = vand.u32 4294901760, %v1391_v22 }
 0x138   : > { %v1377_v60 = vsub.f32 %v1132_v59, %v1343_v26 }
 0x139   : > { %v1341_v14 = vand.u32 4294901760, %v1134_v62 }
 0x13a   : > { %v1378_v15 = vand.u32 4294901760, %v1377_v60 }
 0x13b   : > { %v1371_v16 = vsub.f32 %v1134_v62, %v1341_v14  ;;  %1342 = vmatpush.msra.mxu2 %v1341_v14  ;;  %1442 = vmatpush.msrb.mxu1 %v1341_v14 }
 0x13c   : > { %v1379_v2 = vsub.f32 %v1377_v60, %v1378_v15 }
 0x13d   : > { %1344 = vmatpush.msra.mxu2 %v1343_v26  ;;  %1413 = vmatpush.msrb.mxu0 %v1371_v16  ;;  %v1372_v17 = vand.u32 4294901760, %v1371_v16 }
 0x13e   : > { %1444 = vmatpush.msrb.mxu1 %v1343_v26  ;;  %v1380_v18 = vand.u32 4294901760, %v1379_v2 }
 0x13f   : > { %1346 = vmatpush.msra.mxu2 %v1345_v11  ;;  %1416 = vmatpush.msrb.mxu0 %v1377_v60  ;;  %v1373_v45 = vsub.f32 %v1371_v16, %v1372_v17 }
 0x140   : > { %1446 = vmatpush.msrb.mxu1 %v1345_v11 }
 0x141   : > { %1348 = vmatpush.msra.mxu2 %v1347_v9  ;;  %1419 = vmatpush.msrb.mxu0 %v1383_v13  ;;  %v1374_v44 = vand.u32 4294901760, %v1373_v45 }
 0x142   : > { %1448 = vmatpush.msrb.mxu1 %v1347_v9  ;;  %1354 = vmatmul.f32.vlgmr.msra.gmra.mxu2 %v2311_v31 }
 0x143   : > { %1471 = vmatpush.msrb.mxu2 %v1372_v17  ;;  %1375 = vmatpush.msra.mxu3 %v1374_v44 }
 0x144   : > { %1422 = vmatpush.msrb.mxu0 %v1389_v53  ;;  %1452 = vmatmul.f32.vlgmr.msrb.gmra.mxu1 %v2302_v27 }
 0x145   : > { %1475 = vmatpush.msrb.mxu2 %v1378_v15  ;;  %1425 = vmatmul.f32.vlgmr.msrb.gmra.mxu0 %v2298_v61 }
 0x146   : > { %1381 = vmatpush.msra.mxu3 %v1380_v18 }
 0x147   : > { %1479 = vmatpush.msrb.mxu2 %v1384_v28 }
 0x148   : > { %1387 = vmatpush.msra.mxu3 %v1386_v23 }
 0x149   : > { %1483 = vmatpush.msrb.mxu2 %v1390_v55 }
 0x14a   : > { %1393 = vmatpush.msra.mxu3 %v1392_v25  ;;  %1485 = vmatmul.f32.vlgmr.msrb.gmra.mxu2 %v2291_v30 }
 0x14b   : > { %1395 = vmatmul.f32.vlgmr.msra.gmra.mxu3 %v2291_v30 }
 0x14c   : > { %1502 = vmatpush.msrb.mxu3 %v1341_v14 }
 0x14e   : > { %1504 = vmatpush.msrb.mxu3 %v1343_v26 }
 0x150   : > { %1506 = vmatpush.msrb.mxu3 %v1345_v11 }
 0x152   : > { %1508 = vmatpush.msrb.mxu3 %v1347_v9 }
 0x153   : > { %1510 = vmatmul.f32.vlgmr.msrb.gmra.mxu3 %v2291_v30  ;;  %v1844_v30 = vmov 0.0  }
 0x154   : > { %1521 = vst.msk [vmem:[%s2341_s15] sm:$0xff] %vm1520_vm10, %v1844_v30 }
 0x17b   : > { %v1138_v61 = vpop.permute.xlu2 %1137 }
 0x1a0   : > { %v1211_v1 = vpop.f32.mrf.mxu1 }
 0x1a4   : > { %v1170_v27 = vpop.f32.mrf.mxu0  ;;  %v1241_v56 = vpop.f32.mrf.mxu2 }
 0x1a5   : > { %v1171_v29 = vadd.f32 %v1170_v27, %v1138_v61 }
 0x1a6   : > { %v1268_v21 = vpop.f32.mrf.mxu3 }
 0x1a7   : > { %v1212_v41 = vadd.f32 %v1211_v1, %v1171_v29 }
 0x1a8   : > { %v1326_v31 = vpop.f32.mrf.mxu1 }
 0x1a9   : > { %v1242_v63 = vadd.f32 %v1241_v56, %v1212_v41 }
 0x1ab   : > { %v1269_v40 = vadd.f32 %v1268_v21, %v1242_v63 }
 0x1ac   : > { %v1301_v42 = vpop.f32.mrf.mxu0 }
 0x1ad   : > { %v1302_v8 = vadd.f32 %v1301_v42, %v1269_v40 }
 0x1af   : > { %v1327_v50 = vadd.f32 %v1326_v31, %v1302_v8 }
 0x1b1   : > { %1514 = vst [vmem:[%s270_s11] sm:$0xff] %v1327_v50 }
 0x1c1   : > { %v1453_v19 = vpop.f32.mrf.mxu1 }
 0x1c2   : > { %v1426_v35 = vpop.f32.mrf.mxu0 }
 0x1c5   : > { %v1355_v24 = vpop.f32.mrf.mxu2 }
 0x1c6   : > { %v1356_v32 = vadd.f32 %v1355_v24, %v1138_v61 }
 0x1cd   : > { %v1486_v54 = vpop.f32.mrf.mxu2 }
 0x1ce   : > { %v1396_v12 = vpop.f32.mrf.mxu3 }
 0x1cf   : > { %v1397_v39 = vadd.f32 %v1396_v12, %v1356_v32 }
 0x1d1   : > { %v1427_v34 = vadd.f32 %v1426_v35, %v1397_v39 }
 0x1d3   : > { %v1454_v43 = vadd.f32 %v1453_v19, %v1427_v34 }
 0x1d5   : > { %v1487_v47 = vadd.f32 %v1486_v54, %v1454_v43 }
 0x1d6   : > { %v1511_v36 = vpop.f32.mrf.mxu3 }
 0x1d7   : > { %v1512_v49 = vadd.f32 %v1511_v36, %v1487_v47 }
 0x1d9   : > { %1515 = vst [vmem:[%s270_s11 + $0x8] sm:$0xff] %v1512_v49  ;;  %v1523_v48 = vadd.f32 %v1512_v49, %v1327_v50 }
 0x1da   : > { %1790 = shalt.err (!%p1787_p5)
}
 0x1db   : > { %1671 = dma.vmem_to_hbm [thread:$0]  (%p1920_p4), %s1550_s20, 256, %s1552_s27, %s1530_s28   ;;  %1524 = vadd.xlane.f32.xlu2 %v1523_v48  ;;  %v1522_v51 = vld [vmem:[%s2341_s15] sm:$0xff] }
 0x24e   : > { %v1525_v20 = vpop.xlane.xlu2 %1524 }
 0x24f   : > { %v1526_v4 = vadd.f32 %v1525_v20, %v1522_v51 }
 0x251   : > { %1528 = vst.msk [vmem:[%s2341_s15] sm:$0xff] %vm1520_vm10, %v1526_v4 }
 0x252 PF: > { %p1677_p6 = scmp.ge.s32.totalorder %s1841_s26, 2  ;;  %s1566_s30 = sand.u32 1, %s1821_s21  }
 0x253   : > { %s1567_s11 = scalar_lea.sflag [#allocation3], %s1566_s30 }
 0x254   : > { %p1674_p7 = pnand %p1677_p6, %p1927_p8 }
 0x256   : > { %p1675_p9 = pneg %p1674_p7 }
 0x258   : > { %1816 = dma.done.wait (%p1675_p9), %s1567_s11, 256  }
 0x259   : > { %1818 = vsyncadd (%p1675_p9), %s1567_s11, 4294967040  ;;  %s20_s26 = sadd.s32 1, %s1841_s26   ;;  %s2397_s21 = smov %s1825_s22 }
 0x25a   : > { %p17_p4 = scmp.ge.s32.totalorder %s20_s26, 4   ;;  %s2398_s22 = smov %s1829_s23 }
 0x25b   : > { %s2399_s23 = smov %s1933_s10  ;;  %s2400_s24 = smov %s1837_s25 }
 0x25c   : > { %s2401_s25 = smov %s2403_s29  ;;  %19 = sbr.rel (!%p17_p4) target bundleno = 4 (0x4), region = 91 }
 0x261   :  { %1580 = vsyncpa [#allocation3], 1 }
 0x262   :  { %1582 = vsyncpa [#allocation3 + $0x1], 1 }

</bundles_post_ra>
